<compile_context>
chip_gen: v5e
topology: v5e:2x2
jax: 0.10.0
libtpu: 0.0.40
codegen_flags: <defaults>
</compile_context>

<pallas_src>
import jax
import jax.numpy as jnp
from jax.experimental import pallas as pl
from jax.experimental.pallas import tpu as pltpu


def _make_ls_ce_kernel(smoothing: float, classes: int, n_total: int):
    confidence = 1.0 - smoothing
    smooth_val = smoothing / (classes - 1)

    def kernel(pred_ref, target_ref, out_ref):
        # pred_ref:   (C, TN)  float   -- classes on sublanes, batch on lanes
        # target_ref: (1, TN)  int32
        # out_ref:    (1, 128) float32 -- per-tile partial sum (broadcast over lanes)
        x = pred_ref[...].astype(jnp.float32)   # cast in-kernel (bf16 DMAs stay bf16)
        c, tn = x.shape

        # Numerically stable log-softmax pieces; reductions over the small
        # class axis (sublanes), not the 128-wide lane axis.
        m = jnp.max(x, axis=0, keepdims=True)                              # (1, TN)
        shifted = x - m                                                    # (C, TN)
        lse = jnp.log(jnp.sum(jnp.exp(shifted), axis=0, keepdims=True))    # (1, TN)

        # Extract shifted[target] per column with a sublane-iota select.
        # TODO(synk): targets are assumed to lie in [0, classes); out-of-range
        # indices silently give an all-smooth row (same precondition as scatter_).
        tgt = target_ref[...]                                              # (1, TN)
        row = jax.lax.broadcasted_iota(jnp.int32, (c, tn), 0)              # class idx
        tgt_shift = jnp.sum(jnp.where(row == tgt, shifted, 0.0),
                            axis=0, keepdims=True)                         # (1, TN)
        sum_shift = jnp.sum(shifted, axis=0, keepdims=True)                # (1, TN)

        per_col = (lse
                   - jnp.float32(smooth_val) * sum_shift
                   - jnp.float32(confidence - smooth_val) * tgt_shift)     # (1, TN)

        # Mask padded batch columns (partial last tile) so the global mean is exact.
        col = jax.lax.broadcasted_iota(jnp.int32, (1, tn), 1) + pl.program_id(0) * tn
        per_col = jnp.where(col < n_total, per_col, 0.0)

        out_ref[...] = jnp.full((1, 128), jnp.sum(per_col), dtype=jnp.float32)

    return kernel


def label_smoothing_cross_entropy(pred, target, *, smoothing=0.1, classes=5,
                                  tile_n=2048):
    """pred: (N, C) float, target: (N,) int -> scalar float32 loss (batch mean)."""
    n, c = pred.shape
    assert c == classes

    # Lane-dense relayout: batch -> lanes (last axis), classes -> sublanes.
    pred_t = pred.T                                      # (C, N), keep input dtype
    tgt = target.astype(jnp.int32).reshape(1, n)         # (1, N)

    # Tile the batch (lane) axis in multiples of 128 lanes.
    tile_n = max(128, (int(tile_n) // 128) * 128)
    n_min = pl.cdiv(n, 128) * 128
    tile = min(tile_n, n_min)
    num_tiles = pl.cdiv(n_min, tile)
    n_pad = num_tiles * tile
    if n_pad != n:
        pred_t = jnp.pad(pred_t, ((0, 0), (0, n_pad - n)))
        tgt = jnp.pad(tgt, ((0, 0), (0, n_pad - n)))

    kernel = _make_ls_ce_kernel(smoothing, classes, n)

    cost = pl.CostEstimate(
        flops=6 * n_pad * c,
        transcendentals=n_pad * (c + 1),
        bytes_accessed=pred.size * pred.dtype.itemsize + n_pad * 4 + num_tiles * 128 * 4,
    )

    # One (1, 128) lane-dense partial-sum block per tile; final reduce in wrapper.
    out = pl.pallas_call(
        kernel,
        out_shape=jax.ShapeDtypeStruct((1, 128 * num_tiles), jnp.float32),
        grid=(num_tiles,),
        in_specs=[
            pl.BlockSpec((c, tile), lambda i: (0, i)),    # pred (C, TN)
            pl.BlockSpec((1, tile), lambda i: (0, i)),    # target (1, TN)
        ],
        out_specs=pl.BlockSpec((1, 128), lambda i: (0, i)),
        compiler_params=pltpu.CompilerParams(
            dimension_semantics=("parallel",),            # v7x: shard tiles across TCs
        ),
        cost_estimate=cost,
    )(pred_t, tgt)

    partials = out.reshape(num_tiles, 128)[:, 0]          # identical values per lane
    return jnp.sum(partials) / jnp.float32(n)


def _reference(pred, target, smoothing=0.1, classes=5):
    confidence = 1.0 - smoothing
    log_pred = jax.nn.log_softmax(pred.astype(jnp.float32), axis=-1)
    true_dist = jnp.full_like(log_pred, smoothing / (classes - 1))
    true_dist = true_dist.at[jnp.arange(pred.shape[0]), target].set(confidence)
    return jnp.mean(jnp.sum(-true_dist * log_pred, axis=-1))


if __name__ == "__main__":
    key = jax.random.PRNGKey(0)
    k1, k2, k3, k4 = jax.random.split(key, 4)

    # Module-default toy case: batch of 8 samples, 5 classes.
    N, C = 8, 5
    pred = jax.random.normal(k1, (N, C), dtype=jnp.float32)
    target = jax.random.randint(k2, (N,), 0, C, dtype=jnp.int32)

    loss = label_smoothing_cross_entropy(pred, target, smoothing=0.1, classes=C)
    loss = jax.block_until_ready(loss)
    ref = _reference(pred, target, smoothing=0.1, classes=C)
    assert jnp.allclose(loss, ref, atol=1e-5, rtol=1e-5), (loss, ref)

    # Multi-tile + partial-tile masking path.
    N2 = 300
    pred2 = jax.random.normal(k3, (N2, C), dtype=jnp.float32)
    target2 = jax.random.randint(k4, (N2,), 0, C, dtype=jnp.int32)
    loss2 = label_smoothing_cross_entropy(pred2, target2, smoothing=0.1, classes=C,
                                          tile_n=128)
    loss2 = jax.block_until_ready(loss2)
    ref2 = _reference(pred2, target2, smoothing=0.1, classes=C)
    assert jnp.allclose(loss2, ref2, atol=1e-5, rtol=1e-5), (loss2, ref2)

    print("KERNEL_OK")
</pallas_src>

<mosaic_0001>
module attributes {stable_mosaic.version = 11 : i64} {
  func.func @kernel(%arg0: i32, %arg1: memref<5x128xf32, #tpu.memory_space<vmem>>, %arg2: memref<1x128xi32, #tpu.memory_space<vmem>>, %arg3: memref<1x128xf32, #tpu.memory_space<vmem>>) attributes {dimension_semantics = [#tpu.dimension_semantics<parallel>], iteration_bounds = array<i64: 1>, scalar_prefetch = 0 : i64, scratch_operands = 0 : i64, tpu.core_type = #tpu.core_type<tc>, window_params = [{transform_indices = @transform_0, window_bounds = array<i64: 5, 128>}, {transform_indices = @transform_1, window_bounds = array<i64: 1, 128>}, {transform_indices = @transform_2, window_bounds = array<i64: 1, 128>}]} {
    %c0 = arith.constant 0 : index
    %c0_0 = arith.constant 0 : index
    %0 = vector.load %arg1[%c0, %c0_0] : memref<5x128xf32, #tpu.memory_space<vmem>>, vector<5x128xf32>
    %cst = arith.constant dense<0xFF800000> : vector<128xf32>
    %1 = vector.multi_reduction <maximumf>, %0, %cst [0] : vector<5x128xf32> to vector<128xf32>
    %2 = vector.shape_cast %1 : vector<128xf32> to vector<1x128xf32>
    %3 = vector.broadcast %2 : vector<1x128xf32> to vector<5x128xf32>
    %4 = arith.subf %0, %3 : vector<5x128xf32>
    %5 = math.exp %4 : vector<5x128xf32>
    %cst_1 = arith.constant dense<0.000000e+00> : vector<128xf32>
    %6 = vector.multi_reduction <add>, %5, %cst_1 [0] : vector<5x128xf32> to vector<128xf32>
    %7 = vector.shape_cast %6 : vector<128xf32> to vector<1x128xf32>
    %8 = math.log %7 : vector<1x128xf32>
    %c0_2 = arith.constant 0 : index
    %c0_3 = arith.constant 0 : index
    %9 = vector.load %arg2[%c0_2, %c0_3] : memref<1x128xi32, #tpu.memory_space<vmem>>, vector<1x128xi32>
    %10 = tpu.iota {dimensions = array<i32: 0>} : vector<5x128xi32>
    %11 = vector.broadcast %9 : vector<1x128xi32> to vector<5x128xi32>
    %12 = arith.cmpi eq, %10, %11 : vector<5x128xi32>
    %cst_4 = arith.constant 0.000000e+00 : f32
    %13 = vector.broadcast %cst_4 : f32 to vector<5x128xf32>
    %14 = arith.select %12, %4, %13 : vector<5x128xi1>, vector<5x128xf32>
    %cst_5 = arith.constant dense<0.000000e+00> : vector<128xf32>
    %15 = vector.multi_reduction <add>, %14, %cst_5 [0] : vector<5x128xf32> to vector<128xf32>
    %16 = vector.shape_cast %15 : vector<128xf32> to vector<1x128xf32>
    %cst_6 = arith.constant dense<0.000000e+00> : vector<128xf32>
    %17 = vector.multi_reduction <add>, %4, %cst_6 [0] : vector<5x128xf32> to vector<128xf32>
    %18 = vector.shape_cast %17 : vector<128xf32> to vector<1x128xf32>
    %cst_7 = arith.constant 2.500000e-02 : f32
    %19 = vector.broadcast %cst_7 : f32 to vector<1x128xf32>
    %20 = arith.mulf %19, %18 : vector<1x128xf32>
    %21 = arith.subf %8, %20 : vector<1x128xf32>
    %cst_8 = arith.constant 8.750000e-01 : f32
    %22 = vector.broadcast %cst_8 : f32 to vector<1x128xf32>
    %23 = arith.mulf %22, %16 : vector<1x128xf32>
    %24 = arith.subf %21, %23 : vector<1x128xf32>
    %25 = tpu.iota {dimensions = array<i32: 1>} : vector<1x128xi32>
    %c128_i32 = arith.constant 128 : i32
    %26 = arith.muli %arg0, %c128_i32 : i32
    %27 = vector.broadcast %26 : i32 to vector<1x128xi32>
    %28 = arith.addi %25, %27 : vector<1x128xi32>
    %c8_i32 = arith.constant 8 : i32
    %29 = vector.broadcast %c8_i32 : i32 to vector<1x128xi32>
    %30 = arith.cmpi slt, %28, %29 : vector<1x128xi32>
    %cst_9 = arith.constant 0.000000e+00 : f32
    %31 = vector.broadcast %cst_9 : f32 to vector<1x128xf32>
    %32 = arith.select %30, %24, %31 : vector<1x128xi1>, vector<1x128xf32>
    %33 = vector.shape_cast %32 : vector<1x128xf32> to vector<1x1x128xf32>
    %cst_10 = arith.constant dense<0.000000e+00> : vector<1xf32>
    %34 = vector.multi_reduction <add>, %33, %cst_10 [1, 2] : vector<1x1x128xf32> to vector<1xf32>
    %35 = vector.shape_cast %34 : vector<1xf32> to vector<1x1x1xf32>
    %36 = vector.extract %35[0, 0, 0] : f32 from vector<1x1x1xf32>
    %37 = vector.broadcast %36 : f32 to vector<1x128xf32>
    %c0_11 = arith.constant 0 : index
    %c0_12 = arith.constant 0 : index
    %38 = vector.load %arg3[%c0_11, %c0_12] : memref<1x128xf32, #tpu.memory_space<vmem>>, vector<1x128xf32>
    tpu.vector_store %arg3[%c0_11, %c0_12], %37 {strides = array<i32>} : memref<1x128xf32, #tpu.memory_space<vmem>>, vector<1x128xf32>,
    return
  }
  func.func @transform_0(%arg0: i32) -> (i32, i32) {
    %c0_i32 = arith.constant 0 : i32
    %c0_i32_0 = arith.constant 0 : i32
    return %c0_i32, %arg0 : i32, i32
  }
  func.func @transform_1(%arg0: i32) -> (i32, i32) {
    %c0_i32 = arith.constant 0 : i32
    %c0_i32_0 = arith.constant 0 : i32
    return %c0_i32, %arg0 : i32, i32
  }
  func.func @transform_2(%arg0: i32) -> (i32, i32) {
    %c0_i32 = arith.constant 0 : i32
    %c0_i32_0 = arith.constant 0 : i32
    return %c0_i32, %arg0 : i32, i32
  }
}

</mosaic_0001>

<bundles_post_ra>
// kernel: tpu_custom_call.1
= control target key start
LH: loop header
LB: loop body
LE: loop exit
PB: predicated region body
PF: predicated region fallthrough
CT: control target
= control target key end

     0   :  { %7 = vsyncpa [#allocation3], 0  ;;  %s242_s0 = inlined_call_operand.hbm [shape: f32[5,128], index: 0, kind: input, shape index: {}]   ;;  %s243_s1 = inlined_call_operand.hbm [shape: s32[1,128], index: 1, kind: input, shape index: {}]   ;;  %s244_s2 = inlined_call_operand.hbm [shape: f32[1,128], index: 2, kind: output, shape index: {}]  }
   0x1   :  { %8 = vsyncpa [#allocation6], 0 }
   0x2   :  { %9 = vsyncpa [#allocation4], 0  ;;  %s15_s11 = sshll.u32 %s242_s0, 4  ;;  %s211_s12 = smov [#allocation2]   ;;  %s16_s11 = int_to_ptr.hbm [resolvable:$true] %s15_s11 }
   0x3   :  { %s17_s13 = sshll.u32 %s211_s12, 4  ;;  %s26_s16 = sshll.u32 %s243_s1, 4  ;;  %s18_s13 = int_to_ptr.vmem [resolvable:$true] %s17_s13  ;;  %s27_s16 = int_to_ptr.hbm [resolvable:$true] %s26_s16 }
   0x4   :  { %20 = dma.hbm_to_vmem [thread:$0]  %s16_s11, 128, %s18_s13, [#allocation3]  }
   0x5   :  { %s212_s17 = smov [#allocation5]  }
   0x6   :  { %s28_s18 = sshll.u32 %s212_s17, 4  ;;  %s29_s18 = int_to_ptr.vmem [resolvable:$true] %s28_s18 }
   0x7   :  { %31 = dma.hbm_to_vmem [thread:$0]  %s27_s16, 16, %s29_s18, [#allocation6]  }
   0x8   :  { %205 = dma.done.wait [#allocation3], 128  }
   0x9   :  { %206 = vsyncadd [#allocation3], 4294967168 }
   0xa   :  { %207 = dma.done.wait [#allocation6], 16  }
   0xb   :  { %208 = vsyncadd [#allocation6], 4294967280  ;;  %vm41_vm0 = vcmask 1044480   ;;  %v40_v0 = vld [vmem:[#allocation2] sm:$0x1f]  ;;  %v62_v4 = vlaneseq  ;;  %vm92_vm3 = vcmask 1040384  }
   0xc   :  { %v42_v1 = vsel %vm41_vm0, %v40_v0, -inf  ;;  %v128_v8 = vld [vmem:[#allocation5] ss:$0 sm:$0xff]  ;;  %s213_s0 = smov [#allocation7]   ;;  %s112_s21 = sshll.u32 %s244_s2, 4  ;;  %s113_s21 = int_to_ptr.hbm [resolvable:$true] %s112_s21 }
   0xd   :  { %v43_v2 = vrot.slane %v42_v1, 4  ;;  %v63_v7 = vshrl.u32 %v62_v4, 7  ;;  %v86_v38 = vand.u32 127, %v62_v4  ;;  %s110_s1 = sshll.u32 %s213_s0, 4  ;;  %s111_s1 = int_to_ptr.vmem [resolvable:$true] %s110_s1 }
   0xf   :  { %v44_v3 = vmax.f32 %v42_v1, %v43_v2  ;;  %vm65_vm1 = vcmp.eq.s32.totalorder %v63_v7, %v128_v8  ;;  %vm90_vm2 = vcmp.lt.s32.totalorder %v86_v38, 8 }
  0x11   :  { %v45_v5 = vrot.slane %v44_v3, 2 }
  0x13   :  { %v46_v6 = vmax.f32 %v44_v3, %v45_v5 }
  0x15   :  { %v47_v9 = vrot.slane %v46_v6, 1 }
  0x17   :  { %v48_v10 = vmax.f32 %v46_v6, %v47_v9 }
  0x19   :  { %v49_v11 = vsub.f32 %v40_v0, %v48_v10 }
  0x1b   :  { %v50_v12 = vmul.f32 1.442695, %v49_v11  ;;  %v66_v13 = vsel %vm65_vm1, %v49_v11, 0.0  ;;  %v74_v14 = vsel %vm41_vm0, %v49_v11, 0.0 }
  0x1c   :  { %v67_v15 = vsel %vm41_vm0, %v66_v13, 0.0  ;;  %v75_v16 = vrot.slane %v74_v14, 4 }
  0x1d   :  { %129 = vpow2.f32 %v50_v12  ;;  %v68_v17 = vrot.slane %v67_v15, 4 }
  0x1e   :  { %v76_v18 = vadd.f32 %v75_v16, %v74_v14 }
  0x1f   :  { %v69_v21 = vadd.f32 %v68_v17, %v67_v15 }
  0x20   :  { %v77_v23 = vrot.slane %v76_v18, 2 }
  0x21   :  { %v70_v25 = vrot.slane %v69_v21, 2 }
  0x22   :  { %v78_v27 = vadd.f32 %v77_v23, %v76_v18 }
  0x23   :  { %v130_v19 = vpop.eup %129  ;;  %v71_v29 = vadd.f32 %v70_v25, %v69_v21 }
  0x24   :  { %v52_v20 = vsel %vm41_vm0, %v130_v19, 0.0  ;;  %v79_v31 = vrot.slane %v78_v27, 1 }
  0x25   :  { %v53_v22 = vrot.slane %v52_v20, 4  ;;  %v72_v33 = vrot.slane %v71_v29, 1 }
  0x26   :  { %v80_v34 = vadd.f32 %v79_v31, %v78_v27 }
  0x27   :  { %v54_v24 = vadd.f32 %v53_v22, %v52_v20  ;;  %v73_v35 = vadd.f32 %v72_v33, %v71_v29 }
  0x28   :  { %v81_v36 = vmul.f32 0.025, %v80_v34 }
  0x29   :  { %v55_v26 = vrot.slane %v54_v24, 2  ;;  %v83_v40 = vmul.f32 0.875, %v73_v35 }
  0x2b   :  { %v56_v28 = vadd.f32 %v55_v26, %v54_v24 }
  0x2d   :  { %v57_v30 = vrot.slane %v56_v28, 1 }
  0x2f   :  { %v58_v32 = vadd.f32 %v57_v30, %v56_v28 }
  0x31   :  { %131 = vlog2.f32 %v58_v32 }
  0x37   :  { %v132_v37 = vpop.eup %131 }
  0x38   :  { %v60_v39 = vmul.f32 0.6931472, %v132_v37 }
  0x3a   :  { %v82_v41 = vsub.f32 %v60_v39, %v81_v36 }
  0x3c   :  { %v84_v42 = vsub.f32 %v82_v41, %v83_v40 }
  0x3e   :  { %v91_v43 = vsel %vm90_vm2, %v84_v42, 0.0 }
  0x3f   :  { %v93_v44 = vsel %vm92_vm3, %v91_v43, 0.0 }
  0x40   :  { %94 = vadd.xlane.f32.xlu0 %v93_v44 }
  0xb3   :  { %v95_v45 = vpop.xlane.xlu0 %94 }
  0xb4   :  { %v96_v46 = vrot.slane %v95_v45, 4 }
  0xb6   :  { %v97_v47 = vadd.f32 %v96_v46, %v95_v45 }
  0xb8   :  { %v98_v48 = vrot.slane %v97_v47, 2 }
  0xba   :  { %v99_v49 = vadd.f32 %v98_v48, %v97_v47 }
  0xbc   :  { %v100_v50 = vrot.slane %v99_v49, 1 }
  0xbe   :  { %v101_v51 = vadd.f32 %v100_v50, %v99_v49 }
  0xc0   :  { %123 = vpush %v101_v51 }
  0xf1   :  { %s124_s22 = spop %123 }
  0xf2   :  { %v103_v52 = vstv %s124_s22 }
  0xf3   :  { %104 = vst [vmem:[#allocation7] sm:$0x1] %v103_v52 }
  0xf4   :  { %115 = dma.vmem_to_hbm [thread:$0]  %s111_s1, 16, %s113_s21, [#allocation4]  }
  0xf5   :  { %209 = dma.done.wait [#allocation4], 16  }
  0xf6   :  { %210 = vsyncadd [#allocation4], 4294967280 }
  0xf7   :  { %120 = vsyncpa [#allocation3], 1 }
  0xf8   :  { %121 = vsyncpa [#allocation6], 1 }
  0xf9   :  { %122 = vsyncpa [#allocation4], 1 }

</bundles_post_ra>
